<compile_context>
chip_gen: v6e
topology: v6e:2x2x1
jax: 0.10.0
libtpu: 0.0.40
codegen_flags: <defaults>
</compile_context>

<pallas_src>
import jax
import jax.numpy as jnp
import numpy as np
from jax import lax
from jax.experimental import pallas as pl
from jax.experimental.pallas import tpu as pltpu

_LANE = 128
_DEFAULT_TB = 16384     # batch rows per grid step (~1 MB of f32 x per step at D=16)
_DEFAULT_CHUNK = 2048   # batch rows per in-kernel compute chunk


def _round_up(v, m):
    return ((v + m - 1) // m) * m


def _leaky_relu(x, slope=0.2):
    return jnp.where(x > 0, x, slope * x)


def _make_kernel(chunk, n_chunks):
    """Kernel factory: `chunk` / `n_chunks` are static per-call tiling parameters."""

    def kernel(x_ref, w1_ref, b1_ref, w2_ref, b2_ref, w3_ref, b3_ref, o_ref):
        # Weights/biases are tiny and VMEM-resident (constant index_map); load once.
        w1 = w1_ref[...]; b1 = b1_ref[...]
        w2 = w2_ref[...]; b2 = b2_ref[...]
        w3 = w3_ref[...]; b3 = b3_ref[...]

        def body(c, carry):
            off = pl.multiple_of(c * chunk, _LANE)
            xb = x_ref[pl.ds(off, chunk), :]                       # (chunk, D) f32

            # Linear(D, 32): h1 = w1 @ xb^T -> (32, chunk); batch lands on the lane axis.
            h1 = lax.dot_general(w1, xb, (((1,), (1,)), ((), ())),
                                 preferred_element_type=jnp.float32) + b1
            h1 = _leaky_relu(h1)

            # Linear(32, 16) + Dropout + LeakyReLU(0.2).
            # TODO(synk): Dropout(p=0.2) is identity here (eval/inference forward only);
            # a training forward would need pltpu.prng_seed + pltpu.prng_random_bits.
            h2 = jnp.dot(w2, h1, preferred_element_type=jnp.float32) + b2
            h2 = _leaky_relu(h2)

            # Linear(16, 2) -> (2, chunk)
            logits = jnp.dot(w3, h2, preferred_element_type=jnp.float32) + b3

            # log_softmax over the class axis (axis 0: just 2 sublane rows).
            m = jnp.max(logits, axis=0, keepdims=True)
            z = logits - m
            lse = jnp.log(jnp.sum(jnp.exp(z), axis=0, keepdims=True))
            o_ref[:, pl.ds(off, chunk)] = (z - lse).astype(o_ref.dtype)
            return carry

        lax.fori_loop(0, n_chunks, body, None)

    return kernel


def ckd_forward(x, params, *, tb=_DEFAULT_TB, chunk=_DEFAULT_CHUNK):
    """x: (B, input_size) float32; params: (w1, b1, w2, b2, w3, b3) with
    w_i of shape (out_features, in_features) and b_i of shape (out_features, 1).
    Returns (B, 2) float32 log-probabilities."""
    x = jnp.asarray(x, jnp.float32)
    B, D = x.shape
    w1, b1, w2, b2, w3, b3 = params

    # --- Tile-size selection -------------------------------------------------
    b_ceil = _round_up(B, _LANE)
    tb_eff = min(_round_up(max(tb, _LANE), _LANE), b_ceil)
    if b_ceil >= 2 * _LANE:
        # Keep >= 2 grid steps so the "parallel" axis shards across both v7x TCs.
        tb_eff = min(tb_eff, _round_up(pl.cdiv(b_ceil, 2), _LANE))
    chunk_eff = max(_LANE, _round_up(min(chunk, tb_eff), _LANE))
    tb_eff = max(chunk_eff, (tb_eff // chunk_eff) * chunk_eff)
    n_chunks = tb_eff // chunk_eff
    grid = (pl.cdiv(B, tb_eff),)   # ragged last block handled by Pallas implicit padding

    resident = lambda arr: pl.BlockSpec(arr.shape, lambda i: (0, 0))

    out_t = pl.pallas_call(
        _make_kernel(chunk_eff, n_chunks),
        out_shape=jax.ShapeDtypeStruct((2, B), jnp.float32),
        grid_spec=pltpu.PrefetchScalarGridSpec(
            num_scalar_prefetch=0,
            grid=grid,
            in_specs=[
                pl.BlockSpec((tb_eff, D), lambda i: (i, 0)),   # x tile, native layout
                resident(w1), resident(b1),
                resident(w2), resident(b2),
                resident(w3), resident(b3),
            ],
            out_specs=pl.BlockSpec((2, tb_eff), lambda i: (0, i)),  # lane-dense output slab
        ),
        compiler_params=pltpu.CompilerParams(
            dimension_semantics=("parallel",),
            vmem_limit_bytes=32 * 1024 * 1024,   # room for the big double-buffered x tile
        ),
    )(x, w1, b1, w2, b2, w3, b3)

    # Un-transpose (2, B) -> (B, 2); no batch padding to strip.
    return out_t.T


def init_params(key, input_size):
    """Deterministic init mimicking PyTorch Linear default (uniform +-1/sqrt(fan_in)).
    Weights stored PyTorch-style: (out_features, in_features); biases as (out_features, 1)."""
    ks = jax.random.split(key, 6)

    def linear(kw, kb, fan_in, fan_out):
        bound = 1.0 / np.sqrt(fan_in)
        w = jax.random.uniform(kw, (fan_out, fan_in), jnp.float32, -bound, bound)
        b = jax.random.uniform(kb, (fan_out, 1), jnp.float32, -bound, bound)
        return w, b

    w1, b1 = linear(ks[0], ks[1], input_size, 32)
    w2, b2 = linear(ks[2], ks[3], 32, 16)
    w3, b3 = linear(ks[4], ks[5], 16, 2)
    return w1, b1, w2, b2, w3, b3


def ckd_reference(x, params):
    """Pure-JAX f32 reference in the original (B, D) layout (dropout identity = eval)."""
    w1, b1, w2, b2, w3, b3 = params
    h1 = _leaky_relu(x @ w1.T + b1.T)
    h2 = _leaky_relu(h1 @ w2.T + b2.T)
    logits = h2 @ w3.T + b3.T
    return jax.nn.log_softmax(logits, axis=1)


if __name__ == "__main__":
    key = jax.random.PRNGKey(0)
    k_x, k_x2, k_p = jax.random.split(key, 3)

    input_size = 16
    params = init_params(k_p, input_size)

    # 1) Tiny batch: single grid step whose block is partially out-of-bounds
    #    (exercises Pallas implicit padding + masked writeback; no explicit jnp.pad).
    x = jax.random.normal(k_x, (16, input_size), jnp.float32)
    out = jax.block_until_ready(ckd_forward(x, params))
    ref = ckd_reference(x, params)
    np.testing.assert_allclose(np.asarray(out), np.asarray(ref), rtol=1e-4, atol=1e-4)

    # 2) Ragged batch: >= 2 grid steps, ragged last block.
    x2 = jax.random.normal(k_x2, (300, input_size), jnp.float32)
    out2 = jax.block_until_ready(ckd_forward(x2, params))
    ref2 = ckd_reference(x2, params)
    np.testing.assert_allclose(np.asarray(out2), np.asarray(ref2), rtol=1e-4, atol=1e-4)

    # 3) Same data with a small chunk to exercise the multi-chunk inner loop (n_chunks > 1).
    out3 = jax.block_until_ready(ckd_forward(x2, params, chunk=128))
    np.testing.assert_allclose(np.asarray(out3), np.asarray(ref2), rtol=1e-4, atol=1e-4)

    print("KERNEL_OK")
</pallas_src>

<mosaic_0001>
module attributes {stable_mosaic.version = 11 : i64} {
  func.func @kernel(%arg0: i32, %arg1: memref<128x16xf32, #tpu.memory_space<vmem>>, %arg2: memref<32x16xf32, #tpu.memory_space<vmem>>, %arg3: memref<32x1xf32, #tpu.memory_space<vmem>>, %arg4: memref<16x32xf32, #tpu.memory_space<vmem>>, %arg5: memref<16x1xf32, #tpu.memory_space<vmem>>, %arg6: memref<2x16xf32, #tpu.memory_space<vmem>>, %arg7: memref<2x1xf32, #tpu.memory_space<vmem>>, %arg8: memref<2x128xf32, #tpu.memory_space<vmem>>) attributes {dimension_semantics = [#tpu.dimension_semantics<parallel>], iteration_bounds = array<i64: 1>, scalar_prefetch = 0 : i64, scratch_operands = 0 : i64, tpu.core_type = #tpu.core_type<tc>, window_params = [{transform_indices = @transform_0, window_bounds = array<i64: 128, 16>}, {pipeline_mode = #tpu.pipeline_mode<synchronous>, transform_indices = @transform_1, window_bounds = array<i64: 32, 16>}, {pipeline_mode = #tpu.pipeline_mode<synchronous>, transform_indices = @transform_2, window_bounds = array<i64: 32, 1>}, {pipeline_mode = #tpu.pipeline_mode<synchronous>, transform_indices = @transform_3, window_bounds = array<i64: 16, 32>}, {pipeline_mode = #tpu.pipeline_mode<synchronous>, transform_indices = @transform_4, window_bounds = array<i64: 16, 1>}, {pipeline_mode = #tpu.pipeline_mode<synchronous>, transform_indices = @transform_5, window_bounds = array<i64: 2, 16>}, {pipeline_mode = #tpu.pipeline_mode<synchronous>, transform_indices = @transform_6, window_bounds = array<i64: 2, 1>}, {transform_indices = @transform_7, window_bounds = array<i64: 2, 128>}]} {
    %c0 = arith.constant 0 : index
    %c0_0 = arith.constant 0 : index
    %0 = vector.load %arg2[%c0, %c0_0] : memref<32x16xf32, #tpu.memory_space<vmem>>, vector<32x16xf32>
    %c0_1 = arith.constant 0 : index
    %c0_2 = arith.constant 0 : index
    %1 = vector.load %arg3[%c0_1, %c0_2] : memref<32x1xf32, #tpu.memory_space<vmem>>, vector<32x1xf32>
    %c0_3 = arith.constant 0 : index
    %c0_4 = arith.constant 0 : index
    %2 = vector.load %arg4[%c0_3, %c0_4] : memref<16x32xf32, #tpu.memory_space<vmem>>, vector<16x32xf32>
    %c0_5 = arith.constant 0 : index
    %c0_6 = arith.constant 0 : index
    %3 = vector.load %arg5[%c0_5, %c0_6] : memref<16x1xf32, #tpu.memory_space<vmem>>, vector<16x1xf32>
    %c0_7 = arith.constant 0 : index
    %c0_8 = arith.constant 0 : index
    %4 = vector.load %arg6[%c0_7, %c0_8] : memref<2x16xf32, #tpu.memory_space<vmem>>, vector<2x16xf32>
    %c0_9 = arith.constant 0 : index
    %c0_10 = arith.constant 0 : index
    %5 = vector.load %arg7[%c0_9, %c0_10] : memref<2x1xf32, #tpu.memory_space<vmem>>, vector<2x1xf32>
    %c0_i32 = arith.constant 0 : i32
    %c128_i32 = arith.constant 128 : i32
    %6 = arith.muli %c0_i32, %c128_i32 : i32
    %7 = tpu.assume_multiple %6, 128 : i32
    %8 = arith.index_cast %7 : i32 to index
    %c0_11 = arith.constant 0 : index
    %9 = vector.load %arg1[%8, %c0_11] : memref<128x16xf32, #tpu.memory_space<vmem>>, vector<128x16xf32>
    %cst = arith.constant dense<0.000000e+00> : vector<32x128xf32>
    %10 = tpu.matmul %0, %9, %cst {dimension_numbers = #tpu.dot_dimension_numbers<[1], [1], [0], [0], [0, 0, 1, 0], [], []>} : vector<32x16xf32>, vector<128x16xf32>, vector<32x128xf32> -> vector<32x128xf32>
    %11 = vector.broadcast %1 : vector<32x1xf32> to vector<32x128xf32>
    %12 = arith.addf %10, %11 : vector<32x128xf32>
    %cst_12 = arith.constant 0.000000e+00 : f32
    %13 = vector.broadcast %cst_12 : f32 to vector<32x128xf32>
    %14 = arith.cmpf ogt, %12, %13 : vector<32x128xf32>
    %cst_13 = arith.constant 2.000000e-01 : f32
    %15 = vector.broadcast %cst_13 : f32 to vector<32x128xf32>
    %16 = arith.mulf %15, %12 : vector<32x128xf32>
    %17 = arith.select %14, %12, %16 : vector<32x128xi1>, vector<32x128xf32>
    %cst_14 = arith.constant dense<0.000000e+00> : vector<16x128xf32>
    %18 = tpu.matmul %2, %17, %cst_14 {dimension_numbers = #tpu.dot_dimension_numbers<[1], [0], [0], [1], [0, 0, 1, 1], [], []>} : vector<16x32xf32>, vector<32x128xf32>, vector<16x128xf32> -> vector<16x128xf32>
    %19 = vector.broadcast %3 : vector<16x1xf32> to vector<16x128xf32>
    %20 = arith.addf %18, %19 : vector<16x128xf32>
    %cst_15 = arith.constant 0.000000e+00 : f32
    %21 = vector.broadcast %cst_15 : f32 to vector<16x128xf32>
    %22 = arith.cmpf ogt, %20, %21 : vector<16x128xf32>
    %cst_16 = arith.constant 2.000000e-01 : f32
    %23 = vector.broadcast %cst_16 : f32 to vector<16x128xf32>
    %24 = arith.mulf %23, %20 : vector<16x128xf32>
    %25 = arith.select %22, %20, %24 : vector<16x128xi1>, vector<16x128xf32>
    %cst_17 = arith.constant dense<0.000000e+00> : vector<2x128xf32>
    %26 = tpu.matmul %4, %25, %cst_17 {dimension_numbers = #tpu.dot_dimension_numbers<[1], [0], [0], [1], [0, 0, 1, 1], [], []>} : vector<2x16xf32>, vector<16x128xf32>, vector<2x128xf32> -> vector<2x128xf32>
    %27 = vector.broadcast %5 : vector<2x1xf32> to vector<2x128xf32>
    %28 = arith.addf %26, %27 : vector<2x128xf32>
    %cst_18 = arith.constant dense<0xFF800000> : vector<128xf32>
    %29 = vector.multi_reduction <maximumf>, %28, %cst_18 [0] : vector<2x128xf32> to vector<128xf32>
    %30 = vector.shape_cast %29 : vector<128xf32> to vector<1x128xf32>
    %31 = vector.broadcast %30 : vector<1x128xf32> to vector<2x128xf32>
    %32 = arith.subf %28, %31 : vector<2x128xf32>
    %33 = math.exp %32 : vector<2x128xf32>
    %cst_19 = arith.constant dense<0.000000e+00> : vector<128xf32>
    %34 = vector.multi_reduction <add>, %33, %cst_19 [0] : vector<2x128xf32> to vector<128xf32>
    %35 = vector.shape_cast %34 : vector<128xf32> to vector<1x128xf32>
    %36 = math.log %35 : vector<1x128xf32>
    %37 = vector.broadcast %36 : vector<1x128xf32> to vector<2x128xf32>
    %38 = arith.subf %32, %37 : vector<2x128xf32>
    %c0_20 = arith.constant 0 : index
    %39 = arith.index_cast %7 : i32 to index
    %40 = vector.load %arg8[%c0_20, %39] : memref<2x128xf32, #tpu.memory_space<vmem>>, vector<2x128xf32>
    tpu.vector_store %arg8[%c0_20, %39], %38 {strides = array<i32>} : memref<2x128xf32, #tpu.memory_space<vmem>>, vector<2x128xf32>,
    %c1_i32 = arith.constant 1 : i32
    return
  }
  func.func @transform_0(%arg0: i32) -> (i32, i32) {
    %c0_i32 = arith.constant 0 : i32
    %c0_i32_0 = arith.constant 0 : i32
    return %arg0, %c0_i32 : i32, i32
  }
  func.func @transform_1(%arg0: i32) -> (i32, i32) {
    %c0_i32 = arith.constant 0 : i32
    %c0_i32_0 = arith.constant 0 : i32
    %c0_i32_1 = arith.constant 0 : i32
    return %c0_i32, %c0_i32_0 : i32, i32
  }
  func.func @transform_2(%arg0: i32) -> (i32, i32) {
    %c0_i32 = arith.constant 0 : i32
    %c0_i32_0 = arith.constant 0 : i32
    %c0_i32_1 = arith.constant 0 : i32
    return %c0_i32, %c0_i32_0 : i32, i32
  }
  func.func @transform_3(%arg0: i32) -> (i32, i32) {
    %c0_i32 = arith.constant 0 : i32
    %c0_i32_0 = arith.constant 0 : i32
    %c0_i32_1 = arith.constant 0 : i32
    return %c0_i32, %c0_i32_0 : i32, i32
  }
  func.func @transform_4(%arg0: i32) -> (i32, i32) {
    %c0_i32 = arith.constant 0 : i32
    %c0_i32_0 = arith.constant 0 : i32
    %c0_i32_1 = arith.constant 0 : i32
    return %c0_i32, %c0_i32_0 : i32, i32
  }
  func.func @transform_5(%arg0: i32) -> (i32, i32) {
    %c0_i32 = arith.constant 0 : i32
    %c0_i32_0 = arith.constant 0 : i32
    %c0_i32_1 = arith.constant 0 : i32
    return %c0_i32, %c0_i32_0 : i32, i32
  }
  func.func @transform_6(%arg0: i32) -> (i32, i32) {
    %c0_i32 = arith.constant 0 : i32
    %c0_i32_0 = arith.constant 0 : i32
    %c0_i32_1 = arith.constant 0 : i32
    return %c0_i32, %c0_i32_0 : i32, i32
  }
  func.func @transform_7(%arg0: i32) -> (i32, i32) {
    %c0_i32 = arith.constant 0 : i32
    %c0_i32_0 = arith.constant 0 : i32
    return %c0_i32, %arg0 : i32, i32
  }
}

</mosaic_0001>

<bundles_post_ra>
// kernel: tpu_custom_call.1
= control target key start
LH: loop header
LB: loop body
LE: loop exit
PB: predicated region body
PF: predicated region fallthrough
CT: control target
= control target key end

     0   :  { %vm77_vm0 = vcmask 130048   ;;  %v587_v2 = vmov 0   ;;  %s763_s0 = inlined_call_operand.vmem [shape: f32[16,16], index: 0, kind: input, shape index: {}]   ;;  %s764_s1 = inlined_call_operand.vmem [shape: f32[32,16], index: 1, kind: input, shape index: {}]   ;;  %s765_s2 = inlined_call_operand.vmem [shape: f32[32,1], index: 2, kind: input, shape index: {}]   ;;  %s766_s3 = inlined_call_operand.vmem [shape: f32[16,32], index: 3, kind: input, shape index: {}]   ;;  %s767_s4 = inlined_call_operand.vmem [shape: f32[16,1], index: 4, kind: input, shape index: {}]   ;;  %s768_s5 = inlined_call_operand.vmem [shape: f32[2,16], index: 5, kind: input, shape index: {}]   ;;  %s769_s6 = inlined_call_operand.vmem [shape: f32[2,1], index: 6, kind: input, shape index: {}]   ;;  %s770_s7 = inlined_call_operand.hbm [shape: f32[2,16], index: 7, kind: output, shape index: {}]  }
   0x1   :  { %v56_v0 = vld [vmem:[%s763_s0 + $0x78] sm:$0xff]  ;;  %v55_v1 = vld [vmem:[%s763_s0 + $0x70] sm:$0xff]  ;;  %559 = vset.pattern.permute.xlu0 %v587_v2  ;;  %560 = vset.pattern.permute.xlu1 %v587_v2  ;;  %v54_v3 = vld [vmem:[%s763_s0 + $0x68] sm:$0xff] }
   0x2   :  { %499 = vmatprep.subr.msk.mxu0 %vm77_vm0, %v56_v0  ;;  %v27_v4 = vld [vmem:[%s764_s1] sm:$0xff]  ;;  %v34_v5 = vld [vmem:[%s765_s2 + $0x18] sm:$0xff]  ;;  %v32_v6 = vld [vmem:[%s765_s2 + $0x8] sm:$0xff] }
   0x3   :  { %500 = vmatpush3.xpose.msk.msra.mxu0 %vm77_vm0, %v56_v0  ;;  %531 = vmatprep.mubr.msk.f32.mxu0 %vm77_vm0, %v27_v4  ;;  %v53_v7 = vld [vmem:[%s763_s0 + $0x60] sm:$0xff]  ;;  %v33_v8 = vld [vmem:[%s765_s2 + $0x10] sm:$0xff] }
   0x4   :  { %501 = vmatprep.subr.msk.mxu0 %vm77_vm0, %v55_v1  ;;  %74 = vperm.xlu0 %559, %v34_v5   ;;  %v31_v9 = vld [vmem:[%s765_s2] sm:$0xff] }
   0x5   :  { %64 = vperm.xlu1 %560, %v32_v6  }
   0x7   :  { %502 = vmatpush3.xpose.msk.msra.mxu0 %vm77_vm0, %v55_v1 }
   0x8   :  { %503 = vmatprep.subr.msk.mxu0 %vm77_vm0, %v54_v3 }
   0x9   :  { %12 = vsyncpa [#allocation3], 0  ;;  %69 = vperm.xlu0 %559, %v33_v8   ;;  %v52_v10 = vld [vmem:[%s763_s0 + $0x58] sm:$0xff]  ;;  %v38_v11 = vld [vmem:[%s767_s4 + $0x8] sm:$0xff]  ;;  %59 = vperm.xlu1 %560, %v31_v9   ;;  %vm245_vm1 = vcmask 261120   ;;  %v588_v50 = vmov 0.0  }
   0xa   :  { %v37_v12 = vld [vmem:[%s767_s4] sm:$0xff]  ;;  %v51_v13 = vld [vmem:[%s763_s0 + $0x50] sm:$0xff]  ;;  %v50_v15 = vld [vmem:[%s763_s0 + $0x48] sm:$0xff]  ;;  %vm589_vm6 = vmmov 0   ;;  %vm411_vm9 = vcmask 1041408  }
   0xb   :  { %504 = vmatpush3.xpose.msk.msra.mxu0 %vm77_vm0, %v54_v3  ;;  %v40_v14 = vld [vmem:[%s769_s6] sm:$0x3]  ;;  %v48_v17 = vld [vmem:[%s763_s0 + $0x38] sm:$0xff]  ;;  %v47_v18 = vld [vmem:[%s763_s0 + $0x30] sm:$0xff] }
   0xc   :  { %505 = vmatprep.subr.msk.mxu0 %vm77_vm0, %v53_v7  ;;  %v49_v16 = vld [vmem:[%s763_s0 + $0x40] sm:$0xff]  ;;  %v46_v19 = vld [vmem:[%s763_s0 + $0x28] sm:$0xff]  ;;  %v44_v21 = vld [vmem:[%s763_s0 + $0x18] sm:$0xff] }
   0xd   :  { %242 = vperm.xlu0 %559, %v38_v11   ;;  %237 = vperm.xlu1 %560, %v37_v12   ;;  %v45_v20 = vld [vmem:[%s763_s0 + $0x20] sm:$0xff]  ;;  %v43_v22 = vld [vmem:[%s763_s0 + $0x10] sm:$0xff]  ;;  %v42_v23 = vld [vmem:[%s763_s0 + $0x8] sm:$0xff] }
   0xe   :  { %v41_v24 = vld [vmem:[%s763_s0] sm:$0xff]  ;;  %v28_v25 = vld [vmem:[%s764_s1 + $0x8] sm:$0xff]  ;;  %v29_v26 = vld [vmem:[%s764_s1 + $0x10] sm:$0xff] }
   0xf   :  { %506 = vmatpush3.xpose.msk.msra.mxu0 %vm77_vm0, %v53_v7  ;;  %v30_v27 = vld [vmem:[%s764_s1 + $0x18] sm:$0xff]  ;;  %v35_v28 = vld [vmem:[%s766_s3] sm:$0xff]  ;;  %v36_v49 = vld [vmem:[%s766_s3 + $0x8] sm:$0xff] }
  0x10   :  { %507 = vmatprep.subr.msk.mxu0 %vm77_vm0, %v52_v10  ;;  %545 = vmatprep.mubr.msk.f32.mxu1 %vm245_vm1, %v35_v28  ;;  %v39_v60 = vld [vmem:[%s768_s5] sm:$0x3]  ;;  %s590_s5 = smov [#allocation2]  }
  0x11   :  { %335 = vperm.xlu0 %559, %v40_v14   ;;  %s439_s30 = sshll.u32 %s590_s5, 4  ;;  %s440_s30 = int_to_ptr.vmem [resolvable:$true] %s439_s30 }
  0x12   :  { %s565_s6 = scalar_lea.vmem %s440_s30, 32  ;;  %p570_p1 = scmp.lt.s32.totalorder %s440_s30, %s440_s30 }
  0x13   :  { %508 = vmatpush3.xpose.msk.msra.mxu0 %vm77_vm0, %v52_v10  ;;  %p566_p0 = scmp.ne.s32.totalorder %s440_s30, %s565_s6  ;;  %p571_p2 = scmp.lt.s32.totalorder %s565_s6, %s565_s6 }
  0x14   :  { %509 = vmatprep.subr.msk.mxu0 %vm77_vm0, %v51_v13 }
  0x15   :  { %p572_p3 = por %p571_p2, %p570_p1 }
  0x17   :  { %510 = vmatpush3.xpose.msk.msra.mxu0 %vm77_vm0, %v51_v13  ;;  %p573_p4 = pnand %p572_p3, %p566_p0 }
  0x18   :  { %511 = vmatprep.subr.msk.mxu0 %vm77_vm0, %v50_v15 }
  0x1b   :  { %512 = vmatpush3.xpose.msk.msra.mxu0 %vm77_vm0, %v50_v15 }
  0x1c   :  { %513 = vmatprep.subr.msk.mxu0 %vm77_vm0, %v49_v16 }
  0x1f   :  { %514 = vmatpush3.xpose.msk.msra.mxu0 %vm77_vm0, %v49_v16 }
  0x20   :  { %515 = vmatprep.subr.msk.mxu0 %vm77_vm0, %v48_v17 }
  0x23   :  { %516 = vmatpush3.xpose.msk.msra.mxu0 %vm77_vm0, %v48_v17 }
  0x24   :  { %517 = vmatprep.subr.msk.mxu0 %vm77_vm0, %v47_v18 }
  0x27   :  { %518 = vmatpush3.xpose.msk.msra.mxu0 %vm77_vm0, %v47_v18 }
  0x28   :  { %519 = vmatprep.subr.msk.mxu0 %vm77_vm0, %v46_v19 }
  0x2b   :  { %520 = vmatpush3.xpose.msk.msra.mxu0 %vm77_vm0, %v46_v19 }
  0x2c   :  { %521 = vmatprep.subr.msk.mxu0 %vm77_vm0, %v45_v20 }
  0x2f   :  { %522 = vmatpush3.xpose.msk.msra.mxu0 %vm77_vm0, %v45_v20 }
  0x30   :  { %523 = vmatprep.subr.msk.mxu0 %vm77_vm0, %v44_v21 }
  0x33   :  { %524 = vmatpush3.xpose.msk.msra.mxu0 %vm77_vm0, %v44_v21 }
  0x34   :  { %525 = vmatprep.subr.msk.mxu0 %vm77_vm0, %v43_v22 }
  0x37   :  { %526 = vmatpush3.xpose.msk.msra.mxu0 %vm77_vm0, %v43_v22 }
  0x38   :  { %527 = vmatprep.subr.msk.mxu0 %vm77_vm0, %v42_v23 }
  0x3b   :  { %528 = vmatpush3.xpose.msk.msra.mxu0 %vm77_vm0, %v42_v23 }
  0x3c   :  { %529 = vmatprep.subr.msk.mxu0 %vm77_vm0, %v41_v24 }
  0x3f   :  { %530 = vmatpush3.xpose.msk.msra.mxu0 %vm77_vm0, %v41_v24 }
  0x42   :  { %532 = vmatmul.mubr.msk.f32.vlgmr.msra.gmra.mxu0 %vm77_vm0, %v28_v25 }
  0x43   :  { %534 = vmatprep.mubr.msk.f32.mxu0 %vm77_vm0, %v29_v26 }
  0x46   :  { %535 = vmatmul.mubr.msk.f32.gmra.mxu0 %vm77_vm0, %v30_v27 }
  0x7f   :  { %v75_v30 = vpop.permute.xlu0 %74 }
  0x80   :  { %v65_v29 = vpop.permute.xlu1 %64 }
  0x84   :  { %v60_v33 = vpop.permute.xlu1 %59  ;;  %v70_v37 = vpop.permute.xlu0 %69 }
  0x88   :  { %v243_v51 = vpop.permute.xlu0 %242  ;;  %v238_v54 = vpop.permute.xlu1 %237 }
  0x8c   :  { %v336_v62 = vpop.permute.xlu0 %335 }
 0x102   :  { %v533_v31 = vpop.f32.mrf.mxu0 }
 0x103   :  { %v210_v35 = vadd.f32 %v533_v31, %v65_v29 }
 0x104   :  { %v204_v32 = vpop.f32.mrf.mxu0 }
 0x105   :  { %v205_v39 = vadd.f32 %v204_v32, %v60_v33  ;;  %v228_v42 = vmul.f32 0.2, %v210_v35  ;;  %vm224_vm4 = vcmp.gt.f32.partialorder %v210_v35, 0.0 }
 0x106   :  { %v536_v34 = vpop.f32.mrf.mxu0 }
 0x107   :  { %v220_v36 = vadd.f32 %v536_v34, %v75_v30  ;;  %v227_v45 = vmul.f32 0.2, %v205_v39  ;;  %vm223_vm5 = vcmp.gt.f32.partialorder %v205_v39, 0.0  ;;  %v232_v47 = vsel %vm224_vm4, %v210_v35, %v228_v42 }
 0x108   :  { %v214_v38 = vpop.f32.mrf.mxu0 }
 0x109   :  { %v215_v40 = vadd.f32 %v214_v38, %v70_v37  ;;  %vm226_vm2 = vcmp.gt.f32.partialorder %v220_v36, 0.0  ;;  %v230_v41 = vmul.f32 0.2, %v220_v36  ;;  %v231_v48 = vsel %vm223_vm5, %v205_v39, %v227_v45 }
 0x10b   :  { %v229_v43 = vmul.f32 0.2, %v215_v40  ;;  %v234_v44 = vsel %vm226_vm2, %v220_v36, %v230_v41  ;;  %vm225_vm3 = vcmp.gt.f32.partialorder %v215_v40, 0.0 }
 0x10c   :  { %537 = vmatprep.subr.mxu1 %v234_v44 }
 0x10d   :  { %538 = vmatpush3.msra.mxu1 %v234_v44  ;;  %v233_v46 = vsel %vm225_vm3, %v215_v40, %v229_v43 }
 0x10e   :  { %539 = vmatprep.subr.mxu1 %v233_v46 }
 0x10f   :  { %540 = vmatpush3.msra.mxu1 %v233_v46 }
 0x110   :  { %541 = vmatprep.subr.mxu1 %v232_v47 }
 0x111   :  { %542 = vmatpush3.msra.mxu1 %v232_v47 }
 0x112   :  { %543 = vmatprep.subr.mxu1 %v231_v48 }
 0x113   :  { %544 = vmatpush3.msra.mxu1 %v231_v48 }
 0x114   :  { %546 = vmatmul.mubr.msk.f32.vlgmr.msra.gmra.mxu1 %vm245_vm1, %v36_v49  ;;  %548 = vmatprep.subr.mxu1 %v588_v50 }
 0x115   :  { %552 = vmatprep.mubr.msk.f32.mxu1 %vm589_vm6, %v588_v50 }
 0x1d4   :  { %v547_v52 = vpop.f32.mrf.mxu1 }
 0x1d5   :  { %v324_v53 = vadd.f32 %v547_v52, %v243_v51 }
 0x1d6   :  { %v318_v55 = vpop.f32.mrf.mxu1 }
 0x1d7   :  { %vm328_vm7 = vcmp.gt.f32.partialorder %v324_v53, 0.0  ;;  %v330_v56 = vmul.f32 0.2, %v324_v53  ;;  %v319_v57 = vadd.f32 %v318_v55, %v238_v54 }
 0x1d9   :  { %vm327_vm8 = vcmp.gt.f32.partialorder %v319_v57, 0.0  ;;  %v329_v58 = vmul.f32 0.2, %v319_v57  ;;  %v332_v59 = vsel %vm328_vm7, %v324_v53, %v330_v56 }
 0x1da   :  { %549 = vmatpush3.msra.mxu1 %v332_v59 }
 0x1db   :  { %550 = vmatprep.subr.mxu1 %v588_v50  ;;  %v331_v61 = vsel %vm327_vm8, %v319_v57, %v329_v58 }
 0x1dc   :  { %551 = vmatpush3.msra.mxu1 %v331_v61 }
 0x1dd   :  { %553 = vmatmul.mubr.msk.f32.vlgmr.msra.gmra.mxu1 %vm77_vm0, %v39_v60 }
 0x29d   :  { %v407_v63 = vpop.f32.mrf.mxu1 }
 0x29e   :  { %v408_v0 = vadd.f32 %v407_v63, %v336_v62 }
 0x29f   :  { %v554_v1 = vpop.f32.mrf.mxu1 }
 0x2a0   :  { %v412_v2 = vsel %vm411_vm9, %v408_v0, -inf }
 0x2a1   :  { %v413_v3 = vrot.slane %v412_v2, 4 }
 0x2a3   :  { %v414_v4 = vmax.f32 %v412_v2, %v413_v3 }
 0x2a5   :  { %v415_v5 = vrot.slane %v414_v4, 2 }
 0x2a7   :  { %v416_v6 = vmax.f32 %v414_v4, %v415_v5 }
 0x2a9   :  { %v417_v7 = vrot.slane %v416_v6, 1 }
 0x2ab   :  { %v418_v8 = vmax.f32 %v416_v6, %v417_v7 }
 0x2ad   :  { %v419_v9 = vsub.f32 %v408_v0, %v418_v8 }
 0x2af   :  { %v420_v10 = vmul.f32 1.442695, %v419_v9 }
 0x2b1   :  { %561 = vpow2.f32 %v420_v10 }
 0x2be   :  { %v562_v11 = vpop.eup %561 }
 0x2bf   :  { %v422_v12 = vsel %vm411_vm9, %v562_v11, 0.0 }
 0x2c0   :  { %v423_v13 = vrot.slane %v422_v12, 4 }
 0x2c2   :  { %v424_v14 = vadd.f32 %v423_v13, %v422_v12 }
 0x2c4   :  { %v425_v15 = vrot.slane %v424_v14, 2 }
 0x2c6   :  { %v426_v16 = vadd.f32 %v425_v15, %v424_v14 }
 0x2c8   :  { %v427_v17 = vrot.slane %v426_v16, 1 }
 0x2ca   :  { %v428_v18 = vadd.f32 %v427_v17, %v426_v16 }
 0x2cc   :  { %563 = vlog2.f32 %v428_v18 }
 0x2d9   :  { %v564_v19 = vpop.eup %563 }
 0x2da   :  { %v430_v20 = vmul.f32 0.6931472, %v564_v19 }
 0x2dc   :  { %v431_v21 = vsub.f32 %v419_v9, %v430_v20 }
 0x2de   :  { %432 = vst [vmem:[#allocation2] sm:$0x3] %v431_v21 }
 0x2df   :  { %576 = shalt.err (!%p573_p4)
}
 0x2e0   :  { %442 = dma.vmem_to_hbm [thread:$0]  %s440_s30, 32, %s770_s7, [#allocation3]  }
 0x2e1   :  { %585 = dma.done.wait [#allocation3], 32  }
 0x2e2   :  { %586 = vsyncadd [#allocation3], 4294967264 }
 0x2e3   :  { %446 = vsyncpa [#allocation3], 1 }

</bundles_post_ra>
